<compile_context>
chip_gen: v7x
topology: tpu7x:2x2x1
jax: 0.10.0
libtpu: 0.0.40
codegen_flags: <defaults>
</compile_context>

<pallas_src>
import functools

import jax
import jax.numpy as jnp
from jax.experimental import pallas as pl
from jax.experimental.pallas import tpu as pltpu


def _conv3x3_tanh_kernel(x_ref, w_ref, o_ref, *, shifts, out_len, nb):
    """Processes Nb batch images per grid step.

    x_ref : (Nb, Cin, P)    bf16, zero-padded + spatially flattened image
    w_ref : (9, Cout, Cin)  bf16, tap-major conv weight (t = kh*3 + kw)
    o_ref : (Nb, Cout, L)   L = H*(W+2) - 2 flattened output positions
    """
    cout = o_ref.shape[1]
    for b in range(nb):                       # statically unrolled batch block
        acc = jnp.zeros((cout, out_len), dtype=jnp.float32)
        for t, s in enumerate(shifts):        # 9 unrolled tap matmuls (no im2col)
            acc += jnp.dot(w_ref[t], x_ref[b, :, pl.ds(s, out_len)],
                           preferred_element_type=jnp.float32)
        o_ref[b] = jnp.tanh(acc).astype(o_ref.dtype)


def _pick_batch_block(n, bytes_per_img, budget_bytes, max_nb=8):
    """Largest divisor of n (<= max_nb) whose block fits the VMEM budget."""
    nb_cap = max(1, min(n, max_nb, budget_bytes // max(bytes_per_img, 1)))
    for nb in range(nb_cap, 0, -1):
        if n % nb == 0:
            return nb
    return 1


@jax.jit
def get_image_forward(h_code_nchw, weight_oihw):
    """Forward pass of GET_IMAGE: tanh(conv3x3(h_code)), NCHW in / NCHW out.

    h_code_nchw : (N, Cin, H, W)      float32 activation
    weight_oihw : (Cout=3, Cin, 3, 3) conv weight, PyTorch OIHW convention
    returns     : (N, 3, H, W)        float32
    """
    N, Cin, H, W = h_code_nchw.shape
    Cout = weight_oihw.shape[0]
    Hp, Wp = H + 2, W + 2
    P = Hp * Wp                     # flattened padded-image length
    L = H * Wp - 2                  # flattened output length (junk cols W, W+1)
    shifts = tuple(kh * Wp + kw for kh in range(3) for kw in range(3))

    # bf16 operands for the MXU; the cast fuses with the pad into one pass.
    # TODO(synk): move the zero-pad in-kernel (halo DMA into a zeroed VMEM
    # scratch) to drop the extra HBM pass this wrapper-side pad costs.
    x_flat = jnp.pad(h_code_nchw.astype(jnp.bfloat16),
                     ((0, 0), (0, 0), (1, 1), (1, 1))).reshape(N, Cin, P)

    # OIHW -> (9, Cout, Cin) tap-major: w_taps[kh*3+kw, co, ci] = w[co, ci, kh, kw].
    w_taps = jnp.transpose(weight_oihw, (2, 3, 0, 1)).reshape(9, Cout, Cin)
    w_taps = w_taps.astype(jnp.bfloat16)

    # Scoped-VMEM limit: 48 MiB is safe on v7x (64 MiB physical) and leaves
    # headroom on v5e/v6e.  Size the per-step batch block well under it.
    vmem_limit = 48 * 1024 * 1024
    bytes_per_img = (Cin * P * 2) * 2 + (Cout * L * 4) * 2 + Cout * L * 4
    nb = _pick_batch_block(N, bytes_per_img, vmem_limit // 2)

    kernel = functools.partial(_conv3x3_tanh_kernel,
                               shifts=shifts, out_len=L, nb=nb)

    # TODO(synk): for very large images (H, W >= 256) or N == 1 on v7x, add a
    # row-tile grid axis (1-row halo windows) marked "parallel" so both
    # TensorCores get work; at G_NET sizes each per-step block is a few MB.
    out_flat = pl.pallas_call(
        kernel,
        out_shape=jax.ShapeDtypeStruct((N, Cout, L), h_code_nchw.dtype),
        grid_spec=pltpu.PrefetchScalarGridSpec(
            num_scalar_prefetch=0,
            grid=(N // nb,),
            in_specs=[
                pl.BlockSpec((nb, Cin, P), lambda i: (i, 0, 0)),
                pl.BlockSpec((9, Cout, Cin), lambda i: (0, 0, 0)),
            ],
            out_specs=pl.BlockSpec((nb, Cout, L), lambda i: (i, 0, 0)),
        ),
        compiler_params=pltpu.CompilerParams(
            dimension_semantics=("parallel",),
            vmem_limit_bytes=vmem_limit),
    )(x_flat, w_taps)

    # Un-flatten: out_flat[n, co, h*Wp + w] -> out[n, co, h, w].
    out = jnp.pad(out_flat, ((0, 0), (0, 0), (0, 2))).reshape(N, Cout, H, Wp)
    return out[:, :, :, :W]


def _reference(h_code, weight, operand_dtype):
    """Pure-JAX reference (lax conv, f32 accumulation) for correctness checks."""
    y = jax.lax.conv_general_dilated(
        h_code.astype(operand_dtype), weight.astype(operand_dtype),
        window_strides=(1, 1), padding=((1, 1), (1, 1)),
        dimension_numbers=("NCHW", "OIHW", "NCHW"),
        preferred_element_type=jnp.float32)
    return jnp.tanh(y)


if __name__ == "__main__":
    key = jax.random.PRNGKey(0)
    k_x, k_w = jax.random.split(key)

    N, ngf, H, W = 2, 8, 16, 16
    h_code = jax.random.normal(k_x, (N, ngf, H, W), dtype=jnp.float32)

    # Deterministic conv weight (kaiming-ish scale), shape (3, ngf, 3, 3).
    fan_in = ngf * 3 * 3
    weight = jax.random.normal(k_w, (3, ngf, 3, 3), dtype=jnp.float32)
    weight = weight * (2.0 / fan_in) ** 0.5

    out = jax.block_until_ready(get_image_forward(h_code, weight))
    ref_bf16 = jax.block_until_ready(_reference(h_code, weight, jnp.bfloat16))
    ref_f32 = jax.block_until_ready(_reference(h_code, weight, jnp.float32))

    assert out.shape == (N, 3, H, W)
    assert out.dtype == h_code.dtype
    # Tight check vs a reference fed the same bf16 operands (f32 accumulation).
    assert jnp.allclose(out, ref_bf16, atol=1e-4, rtol=1e-4)
    # Loose check vs the full-f32 torch-equivalent reference (bf16 operand error).
    assert jnp.allclose(out, ref_f32, atol=5e-2)

    print("KERNEL_OK")
</pallas_src>

<mosaic_0001>
module attributes {stable_mosaic.version = 11 : i64} {
  func.func @_conv3x3_tanh_kernel(%arg0: i32, %arg1: memref<2x8x324xbf16, #tpu.memory_space<vmem>>, %arg2: memref<9x3x8xbf16, #tpu.memory_space<vmem>>, %arg3: memref<2x3x286xf32, #tpu.memory_space<vmem>>) attributes {dimension_semantics = [#tpu.dimension_semantics<parallel>], iteration_bounds = array<i64: 1>, scalar_prefetch = 0 : i64, scratch_operands = 0 : i64, tpu.core_type = #tpu.core_type<tc>, window_params = [{transform_indices = @transform_0, window_bounds = array<i64: 2, 8, 324>}, {pipeline_mode = #tpu.pipeline_mode<synchronous>, transform_indices = @transform_1, window_bounds = array<i64: 9, 3, 8>}, {transform_indices = @transform_2, window_bounds = array<i64: 2, 3, 286>}]} {
    %cst = arith.constant 0.000000e+00 : f32
    %0 = vector.broadcast %cst : f32 to vector<3x286xf32>
    %c0 = arith.constant 0 : index
    %c0_0 = arith.constant 0 : index
    %c0_1 = arith.constant 0 : index
    %1 = vector.load %arg2[%c0, %c0_0, %c0_1] : memref<9x3x8xbf16, #tpu.memory_space<vmem>>, vector<1x3x8xbf16>
    %2 = vector.shape_cast %1 : vector<1x3x8xbf16> to vector<3x8xbf16>
    %c0_2 = arith.constant 0 : index
    %c0_3 = arith.constant 0 : index
    %c0_4 = arith.constant 0 : index
    %3 = vector.load %arg1[%c0_2, %c0_3, %c0_4] : memref<2x8x324xbf16, #tpu.memory_space<vmem>>, vector<1x8x286xbf16>
    %4 = vector.shape_cast %3 : vector<1x8x286xbf16> to vector<8x286xbf16>
    %cst_5 = arith.constant dense<0.000000e+00> : vector<3x286xf32>
    %5 = tpu.matmul %2, %4, %cst_5 {dimension_numbers = #tpu.dot_dimension_numbers<[1], [0], [0], [1], [0, 0, 1, 1], [], []>} : vector<3x8xbf16>, vector<8x286xbf16>, vector<3x286xf32> -> vector<3x286xf32>
    %6 = arith.addf %0, %5 : vector<3x286xf32>
    %c1 = arith.constant 1 : index
    %c0_6 = arith.constant 0 : index
    %c0_7 = arith.constant 0 : index
    %7 = vector.load %arg2[%c1, %c0_6, %c0_7] : memref<9x3x8xbf16, #tpu.memory_space<vmem>>, vector<1x3x8xbf16>
    %8 = vector.shape_cast %7 : vector<1x3x8xbf16> to vector<3x8xbf16>
    %c0_8 = arith.constant 0 : index
    %c0_9 = arith.constant 0 : index
    %c1_10 = arith.constant 1 : index
    %9 = vector.load %arg1[%c0_8, %c0_9, %c1_10] : memref<2x8x324xbf16, #tpu.memory_space<vmem>>, vector<1x8x286xbf16>
    %10 = vector.shape_cast %9 : vector<1x8x286xbf16> to vector<8x286xbf16>
    %cst_11 = arith.constant dense<0.000000e+00> : vector<3x286xf32>
    %11 = tpu.matmul %8, %10, %cst_11 {dimension_numbers = #tpu.dot_dimension_numbers<[1], [0], [0], [1], [0, 0, 1, 1], [], []>} : vector<3x8xbf16>, vector<8x286xbf16>, vector<3x286xf32> -> vector<3x286xf32>
    %12 = arith.addf %6, %11 : vector<3x286xf32>
    %c2 = arith.constant 2 : index
    %c0_12 = arith.constant 0 : index
    %c0_13 = arith.constant 0 : index
    %13 = vector.load %arg2[%c2, %c0_12, %c0_13] : memref<9x3x8xbf16, #tpu.memory_space<vmem>>, vector<1x3x8xbf16>
    %14 = vector.shape_cast %13 : vector<1x3x8xbf16> to vector<3x8xbf16>
    %c0_14 = arith.constant 0 : index
    %c0_15 = arith.constant 0 : index
    %c2_16 = arith.constant 2 : index
    %15 = vector.load %arg1[%c0_14, %c0_15, %c2_16] : memref<2x8x324xbf16, #tpu.memory_space<vmem>>, vector<1x8x286xbf16>
    %16 = vector.shape_cast %15 : vector<1x8x286xbf16> to vector<8x286xbf16>
    %cst_17 = arith.constant dense<0.000000e+00> : vector<3x286xf32>
    %17 = tpu.matmul %14, %16, %cst_17 {dimension_numbers = #tpu.dot_dimension_numbers<[1], [0], [0], [1], [0, 0, 1, 1], [], []>} : vector<3x8xbf16>, vector<8x286xbf16>, vector<3x286xf32> -> vector<3x286xf32>
    %18 = arith.addf %12, %17 : vector<3x286xf32>
    %c3 = arith.constant 3 : index
    %c0_18 = arith.constant 0 : index
    %c0_19 = arith.constant 0 : index
    %19 = vector.load %arg2[%c3, %c0_18, %c0_19] : memref<9x3x8xbf16, #tpu.memory_space<vmem>>, vector<1x3x8xbf16>
    %20 = vector.shape_cast %19 : vector<1x3x8xbf16> to vector<3x8xbf16>
    %c0_20 = arith.constant 0 : index
    %c0_21 = arith.constant 0 : index
    %c18 = arith.constant 18 : index
    %21 = vector.load %arg1[%c0_20, %c0_21, %c18] : memref<2x8x324xbf16, #tpu.memory_space<vmem>>, vector<1x8x286xbf16>
    %22 = vector.shape_cast %21 : vector<1x8x286xbf16> to vector<8x286xbf16>
    %cst_22 = arith.constant dense<0.000000e+00> : vector<3x286xf32>
    %23 = tpu.matmul %20, %22, %cst_22 {dimension_numbers = #tpu.dot_dimension_numbers<[1], [0], [0], [1], [0, 0, 1, 1], [], []>} : vector<3x8xbf16>, vector<8x286xbf16>, vector<3x286xf32> -> vector<3x286xf32>
    %24 = arith.addf %18, %23 : vector<3x286xf32>
    %c4 = arith.constant 4 : index
    %c0_23 = arith.constant 0 : index
    %c0_24 = arith.constant 0 : index
    %25 = vector.load %arg2[%c4, %c0_23, %c0_24] : memref<9x3x8xbf16, #tpu.memory_space<vmem>>, vector<1x3x8xbf16>
    %26 = vector.shape_cast %25 : vector<1x3x8xbf16> to vector<3x8xbf16>
    %c0_25 = arith.constant 0 : index
    %c0_26 = arith.constant 0 : index
    %c19 = arith.constant 19 : index
    %27 = vector.load %arg1[%c0_25, %c0_26, %c19] : memref<2x8x324xbf16, #tpu.memory_space<vmem>>, vector<1x8x286xbf16>
    %28 = vector.shape_cast %27 : vector<1x8x286xbf16> to vector<8x286xbf16>
    %cst_27 = arith.constant dense<0.000000e+00> : vector<3x286xf32>
    %29 = tpu.matmul %26, %28, %cst_27 {dimension_numbers = #tpu.dot_dimension_numbers<[1], [0], [0], [1], [0, 0, 1, 1], [], []>} : vector<3x8xbf16>, vector<8x286xbf16>, vector<3x286xf32> -> vector<3x286xf32>
    %30 = arith.addf %24, %29 : vector<3x286xf32>
    %c5 = arith.constant 5 : index
    %c0_28 = arith.constant 0 : index
    %c0_29 = arith.constant 0 : index
    %31 = vector.load %arg2[%c5, %c0_28, %c0_29] : memref<9x3x8xbf16, #tpu.memory_space<vmem>>, vector<1x3x8xbf16>
    %32 = vector.shape_cast %31 : vector<1x3x8xbf16> to vector<3x8xbf16>
    %c0_30 = arith.constant 0 : index
    %c0_31 = arith.constant 0 : index
    %c20 = arith.constant 20 : index
    %33 = vector.load %arg1[%c0_30, %c0_31, %c20] : memref<2x8x324xbf16, #tpu.memory_space<vmem>>, vector<1x8x286xbf16>
    %34 = vector.shape_cast %33 : vector<1x8x286xbf16> to vector<8x286xbf16>
    %cst_32 = arith.constant dense<0.000000e+00> : vector<3x286xf32>
    %35 = tpu.matmul %32, %34, %cst_32 {dimension_numbers = #tpu.dot_dimension_numbers<[1], [0], [0], [1], [0, 0, 1, 1], [], []>} : vector<3x8xbf16>, vector<8x286xbf16>, vector<3x286xf32> -> vector<3x286xf32>
    %36 = arith.addf %30, %35 : vector<3x286xf32>
    %c6 = arith.constant 6 : index
    %c0_33 = arith.constant 0 : index
    %c0_34 = arith.constant 0 : index
    %37 = vector.load %arg2[%c6, %c0_33, %c0_34] : memref<9x3x8xbf16, #tpu.memory_space<vmem>>, vector<1x3x8xbf16>
    %38 = vector.shape_cast %37 : vector<1x3x8xbf16> to vector<3x8xbf16>
    %c0_35 = arith.constant 0 : index
    %c0_36 = arith.constant 0 : index
    %c36 = arith.constant 36 : index
    %39 = vector.load %arg1[%c0_35, %c0_36, %c36] : memref<2x8x324xbf16, #tpu.memory_space<vmem>>, vector<1x8x286xbf16>
    %40 = vector.shape_cast %39 : vector<1x8x286xbf16> to vector<8x286xbf16>
    %cst_37 = arith.constant dense<0.000000e+00> : vector<3x286xf32>
    %41 = tpu.matmul %38, %40, %cst_37 {dimension_numbers = #tpu.dot_dimension_numbers<[1], [0], [0], [1], [0, 0, 1, 1], [], []>} : vector<3x8xbf16>, vector<8x286xbf16>, vector<3x286xf32> -> vector<3x286xf32>
    %42 = arith.addf %36, %41 : vector<3x286xf32>
    %c7 = arith.constant 7 : index
    %c0_38 = arith.constant 0 : index
    %c0_39 = arith.constant 0 : index
    %43 = vector.load %arg2[%c7, %c0_38, %c0_39] : memref<9x3x8xbf16, #tpu.memory_space<vmem>>, vector<1x3x8xbf16>
    %44 = vector.shape_cast %43 : vector<1x3x8xbf16> to vector<3x8xbf16>
    %c0_40 = arith.constant 0 : index
    %c0_41 = arith.constant 0 : index
    %c37 = arith.constant 37 : index
    %45 = vector.load %arg1[%c0_40, %c0_41, %c37] : memref<2x8x324xbf16, #tpu.memory_space<vmem>>, vector<1x8x286xbf16>
    %46 = vector.shape_cast %45 : vector<1x8x286xbf16> to vector<8x286xbf16>
    %cst_42 = arith.constant dense<0.000000e+00> : vector<3x286xf32>
    %47 = tpu.matmul %44, %46, %cst_42 {dimension_numbers = #tpu.dot_dimension_numbers<[1], [0], [0], [1], [0, 0, 1, 1], [], []>} : vector<3x8xbf16>, vector<8x286xbf16>, vector<3x286xf32> -> vector<3x286xf32>
    %48 = arith.addf %42, %47 : vector<3x286xf32>
    %c8 = arith.constant 8 : index
    %c0_43 = arith.constant 0 : index
    %c0_44 = arith.constant 0 : index
    %49 = vector.load %arg2[%c8, %c0_43, %c0_44] : memref<9x3x8xbf16, #tpu.memory_space<vmem>>, vector<1x3x8xbf16>
    %50 = vector.shape_cast %49 : vector<1x3x8xbf16> to vector<3x8xbf16>
    %c0_45 = arith.constant 0 : index
    %c0_46 = arith.constant 0 : index
    %c38 = arith.constant 38 : index
    %51 = vector.load %arg1[%c0_45, %c0_46, %c38] : memref<2x8x324xbf16, #tpu.memory_space<vmem>>, vector<1x8x286xbf16>
    %52 = vector.shape_cast %51 : vector<1x8x286xbf16> to vector<8x286xbf16>
    %cst_47 = arith.constant dense<0.000000e+00> : vector<3x286xf32>
    %53 = tpu.matmul %50, %52, %cst_47 {dimension_numbers = #tpu.dot_dimension_numbers<[1], [0], [0], [1], [0, 0, 1, 1], [], []>} : vector<3x8xbf16>, vector<8x286xbf16>, vector<3x286xf32> -> vector<3x286xf32>
    %54 = arith.addf %48, %53 : vector<3x286xf32>
    %55 = math.tanh %54 : vector<3x286xf32>
    %c0_48 = arith.constant 0 : index
    %c0_49 = arith.constant 0 : index
    %c0_50 = arith.constant 0 : index
    %56 = vector.load %arg3[%c0_48, %c0_49, %c0_50] : memref<2x3x286xf32, #tpu.memory_space<vmem>>, vector<1x3x286xf32>
    %57 = vector.shape_cast %56 : vector<1x3x286xf32> to vector<3x286xf32>
    %58 = vector.shape_cast %55 : vector<3x286xf32> to vector<1x3x286xf32>
    tpu.vector_store %arg3[%c0_48, %c0_49, %c0_50], %58 {strides = array<i32>} : memref<2x3x286xf32, #tpu.memory_space<vmem>>, vector<1x3x286xf32>,
    %cst_51 = arith.constant 0.000000e+00 : f32
    %59 = vector.broadcast %cst_51 : f32 to vector<3x286xf32>
    %c0_52 = arith.constant 0 : index
    %c0_53 = arith.constant 0 : index
    %c0_54 = arith.constant 0 : index
    %60 = vector.load %arg2[%c0_52, %c0_53, %c0_54] : memref<9x3x8xbf16, #tpu.memory_space<vmem>>, vector<1x3x8xbf16>
    %61 = vector.shape_cast %60 : vector<1x3x8xbf16> to vector<3x8xbf16>
    %c1_55 = arith.constant 1 : index
    %c0_56 = arith.constant 0 : index
    %c0_57 = arith.constant 0 : index
    %62 = vector.load %arg1[%c1_55, %c0_56, %c0_57] : memref<2x8x324xbf16, #tpu.memory_space<vmem>>, vector<1x8x286xbf16>
    %63 = vector.shape_cast %62 : vector<1x8x286xbf16> to vector<8x286xbf16>
    %cst_58 = arith.constant dense<0.000000e+00> : vector<3x286xf32>
    %64 = tpu.matmul %61, %63, %cst_58 {dimension_numbers = #tpu.dot_dimension_numbers<[1], [0], [0], [1], [0, 0, 1, 1], [], []>} : vector<3x8xbf16>, vector<8x286xbf16>, vector<3x286xf32> -> vector<3x286xf32>
    %65 = arith.addf %59, %64 : vector<3x286xf32>
    %c1_59 = arith.constant 1 : index
    %c0_60 = arith.constant 0 : index
    %c0_61 = arith.constant 0 : index
    %66 = vector.load %arg2[%c1_59, %c0_60, %c0_61] : memref<9x3x8xbf16, #tpu.memory_space<vmem>>, vector<1x3x8xbf16>
    %67 = vector.shape_cast %66 : vector<1x3x8xbf16> to vector<3x8xbf16>
    %c1_62 = arith.constant 1 : index
    %c0_63 = arith.constant 0 : index
    %c1_64 = arith.constant 1 : index
    %68 = vector.load %arg1[%c1_62, %c0_63, %c1_64] : memref<2x8x324xbf16, #tpu.memory_space<vmem>>, vector<1x8x286xbf16>
    %69 = vector.shape_cast %68 : vector<1x8x286xbf16> to vector<8x286xbf16>
    %cst_65 = arith.constant dense<0.000000e+00> : vector<3x286xf32>
    %70 = tpu.matmul %67, %69, %cst_65 {dimension_numbers = #tpu.dot_dimension_numbers<[1], [0], [0], [1], [0, 0, 1, 1], [], []>} : vector<3x8xbf16>, vector<8x286xbf16>, vector<3x286xf32> -> vector<3x286xf32>
    %71 = arith.addf %65, %70 : vector<3x286xf32>
    %c2_66 = arith.constant 2 : index
    %c0_67 = arith.constant 0 : index
    %c0_68 = arith.constant 0 : index
    %72 = vector.load %arg2[%c2_66, %c0_67, %c0_68] : memref<9x3x8xbf16, #tpu.memory_space<vmem>>, vector<1x3x8xbf16>
    %73 = vector.shape_cast %72 : vector<1x3x8xbf16> to vector<3x8xbf16>
    %c1_69 = arith.constant 1 : index
    %c0_70 = arith.constant 0 : index
    %c2_71 = arith.constant 2 : index
    %74 = vector.load %arg1[%c1_69, %c0_70, %c2_71] : memref<2x8x324xbf16, #tpu.memory_space<vmem>>, vector<1x8x286xbf16>
    %75 = vector.shape_cast %74 : vector<1x8x286xbf16> to vector<8x286xbf16>
    %cst_72 = arith.constant dense<0.000000e+00> : vector<3x286xf32>
    %76 = tpu.matmul %73, %75, %cst_72 {dimension_numbers = #tpu.dot_dimension_numbers<[1], [0], [0], [1], [0, 0, 1, 1], [], []>} : vector<3x8xbf16>, vector<8x286xbf16>, vector<3x286xf32> -> vector<3x286xf32>
    %77 = arith.addf %71, %76 : vector<3x286xf32>
    %c3_73 = arith.constant 3 : index
    %c0_74 = arith.constant 0 : index
    %c0_75 = arith.constant 0 : index
    %78 = vector.load %arg2[%c3_73, %c0_74, %c0_75] : memref<9x3x8xbf16, #tpu.memory_space<vmem>>, vector<1x3x8xbf16>
    %79 = vector.shape_cast %78 : vector<1x3x8xbf16> to vector<3x8xbf16>
    %c1_76 = arith.constant 1 : index
    %c0_77 = arith.constant 0 : index
    %c18_78 = arith.constant 18 : index
    %80 = vector.load %arg1[%c1_76, %c0_77, %c18_78] : memref<2x8x324xbf16, #tpu.memory_space<vmem>>, vector<1x8x286xbf16>
    %81 = vector.shape_cast %80 : vector<1x8x286xbf16> to vector<8x286xbf16>
    %cst_79 = arith.constant dense<0.000000e+00> : vector<3x286xf32>
    %82 = tpu.matmul %79, %81, %cst_79 {dimension_numbers = #tpu.dot_dimension_numbers<[1], [0], [0], [1], [0, 0, 1, 1], [], []>} : vector<3x8xbf16>, vector<8x286xbf16>, vector<3x286xf32> -> vector<3x286xf32>
    %83 = arith.addf %77, %82 : vector<3x286xf32>
    %c4_80 = arith.constant 4 : index
    %c0_81 = arith.constant 0 : index
    %c0_82 = arith.constant 0 : index
    %84 = vector.load %arg2[%c4_80, %c0_81, %c0_82] : memref<9x3x8xbf16, #tpu.memory_space<vmem>>, vector<1x3x8xbf16>
    %85 = vector.shape_cast %84 : vector<1x3x8xbf16> to vector<3x8xbf16>
    %c1_83 = arith.constant 1 : index
    %c0_84 = arith.constant 0 : index
    %c19_85 = arith.constant 19 : index
    %86 = vector.load %arg1[%c1_83, %c0_84, %c19_85] : memref<2x8x324xbf16, #tpu.memory_space<vmem>>, vector<1x8x286xbf16>
    %87 = vector.shape_cast %86 : vector<1x8x286xbf16> to vector<8x286xbf16>
    %cst_86 = arith.constant dense<0.000000e+00> : vector<3x286xf32>
    %88 = tpu.matmul %85, %87, %cst_86 {dimension_numbers = #tpu.dot_dimension_numbers<[1], [0], [0], [1], [0, 0, 1, 1], [], []>} : vector<3x8xbf16>, vector<8x286xbf16>, vector<3x286xf32> -> vector<3x286xf32>
    %89 = arith.addf %83, %88 : vector<3x286xf32>
    %c5_87 = arith.constant 5 : index
    %c0_88 = arith.constant 0 : index
    %c0_89 = arith.constant 0 : index
    %90 = vector.load %arg2[%c5_87, %c0_88, %c0_89] : memref<9x3x8xbf16, #tpu.memory_space<vmem>>, vector<1x3x8xbf16>
    %91 = vector.shape_cast %90 : vector<1x3x8xbf16> to vector<3x8xbf16>
    %c1_90 = arith.constant 1 : index
    %c0_91 = arith.constant 0 : index
    %c20_92 = arith.constant 20 : index
    %92 = vector.load %arg1[%c1_90, %c0_91, %c20_92] : memref<2x8x324xbf16, #tpu.memory_space<vmem>>, vector<1x8x286xbf16>
    %93 = vector.shape_cast %92 : vector<1x8x286xbf16> to vector<8x286xbf16>
    %cst_93 = arith.constant dense<0.000000e+00> : vector<3x286xf32>
    %94 = tpu.matmul %91, %93, %cst_93 {dimension_numbers = #tpu.dot_dimension_numbers<[1], [0], [0], [1], [0, 0, 1, 1], [], []>} : vector<3x8xbf16>, vector<8x286xbf16>, vector<3x286xf32> -> vector<3x286xf32>
    %95 = arith.addf %89, %94 : vector<3x286xf32>
    %c6_94 = arith.constant 6 : index
    %c0_95 = arith.constant 0 : index
    %c0_96 = arith.constant 0 : index
    %96 = vector.load %arg2[%c6_94, %c0_95, %c0_96] : memref<9x3x8xbf16, #tpu.memory_space<vmem>>, vector<1x3x8xbf16>
    %97 = vector.shape_cast %96 : vector<1x3x8xbf16> to vector<3x8xbf16>
    %c1_97 = arith.constant 1 : index
    %c0_98 = arith.constant 0 : index
    %c36_99 = arith.constant 36 : index
    %98 = vector.load %arg1[%c1_97, %c0_98, %c36_99] : memref<2x8x324xbf16, #tpu.memory_space<vmem>>, vector<1x8x286xbf16>
    %99 = vector.shape_cast %98 : vector<1x8x286xbf16> to vector<8x286xbf16>
    %cst_100 = arith.constant dense<0.000000e+00> : vector<3x286xf32>
    %100 = tpu.matmul %97, %99, %cst_100 {dimension_numbers = #tpu.dot_dimension_numbers<[1], [0], [0], [1], [0, 0, 1, 1], [], []>} : vector<3x8xbf16>, vector<8x286xbf16>, vector<3x286xf32> -> vector<3x286xf32>
    %101 = arith.addf %95, %100 : vector<3x286xf32>
    %c7_101 = arith.constant 7 : index
    %c0_102 = arith.constant 0 : index
    %c0_103 = arith.constant 0 : index
    %102 = vector.load %arg2[%c7_101, %c0_102, %c0_103] : memref<9x3x8xbf16, #tpu.memory_space<vmem>>, vector<1x3x8xbf16>
    %103 = vector.shape_cast %102 : vector<1x3x8xbf16> to vector<3x8xbf16>
    %c1_104 = arith.constant 1 : index
    %c0_105 = arith.constant 0 : index
    %c37_106 = arith.constant 37 : index
    %104 = vector.load %arg1[%c1_104, %c0_105, %c37_106] : memref<2x8x324xbf16, #tpu.memory_space<vmem>>, vector<1x8x286xbf16>
    %105 = vector.shape_cast %104 : vector<1x8x286xbf16> to vector<8x286xbf16>
    %cst_107 = arith.constant dense<0.000000e+00> : vector<3x286xf32>
    %106 = tpu.matmul %103, %105, %cst_107 {dimension_numbers = #tpu.dot_dimension_numbers<[1], [0], [0], [1], [0, 0, 1, 1], [], []>} : vector<3x8xbf16>, vector<8x286xbf16>, vector<3x286xf32> -> vector<3x286xf32>
    %107 = arith.addf %101, %106 : vector<3x286xf32>
    %c8_108 = arith.constant 8 : index
    %c0_109 = arith.constant 0 : index
    %c0_110 = arith.constant 0 : index
    %108 = vector.load %arg2[%c8_108, %c0_109, %c0_110] : memref<9x3x8xbf16, #tpu.memory_space<vmem>>, vector<1x3x8xbf16>
    %109 = vector.shape_cast %108 : vector<1x3x8xbf16> to vector<3x8xbf16>
    %c1_111 = arith.constant 1 : index
    %c0_112 = arith.constant 0 : index
    %c38_113 = arith.constant 38 : index
    %110 = vector.load %arg1[%c1_111, %c0_112, %c38_113] : memref<2x8x324xbf16, #tpu.memory_space<vmem>>, vector<1x8x286xbf16>
    %111 = vector.shape_cast %110 : vector<1x8x286xbf16> to vector<8x286xbf16>
    %cst_114 = arith.constant dense<0.000000e+00> : vector<3x286xf32>
    %112 = tpu.matmul %109, %111, %cst_114 {dimension_numbers = #tpu.dot_dimension_numbers<[1], [0], [0], [1], [0, 0, 1, 1], [], []>} : vector<3x8xbf16>, vector<8x286xbf16>, vector<3x286xf32> -> vector<3x286xf32>
    %113 = arith.addf %107, %112 : vector<3x286xf32>
    %114 = math.tanh %113 : vector<3x286xf32>
    %c1_115 = arith.constant 1 : index
    %c0_116 = arith.constant 0 : index
    %c0_117 = arith.constant 0 : index
    %115 = vector.load %arg3[%c1_115, %c0_116, %c0_117] : memref<2x3x286xf32, #tpu.memory_space<vmem>>, vector<1x3x286xf32>
    %116 = vector.shape_cast %115 : vector<1x3x286xf32> to vector<3x286xf32>
    %117 = vector.shape_cast %114 : vector<3x286xf32> to vector<1x3x286xf32>
    tpu.vector_store %arg3[%c1_115, %c0_116, %c0_117], %117 {strides = array<i32>} : memref<2x3x286xf32, #tpu.memory_space<vmem>>, vector<1x3x286xf32>,
    return
  }
  func.func @transform_0(%arg0: i32) -> (i32, i32, i32) {
    %c0_i32 = arith.constant 0 : i32
    %c0_i32_0 = arith.constant 0 : i32
    %c0_i32_1 = arith.constant 0 : i32
    return %arg0, %c0_i32, %c0_i32_0 : i32, i32, i32
  }
  func.func @transform_1(%arg0: i32) -> (i32, i32, i32) {
    %c0_i32 = arith.constant 0 : i32
    %c0_i32_0 = arith.constant 0 : i32
    %c0_i32_1 = arith.constant 0 : i32
    %c0_i32_2 = arith.constant 0 : i32
    return %c0_i32, %c0_i32_0, %c0_i32_1 : i32, i32, i32
  }
  func.func @transform_2(%arg0: i32) -> (i32, i32, i32) {
    %c0_i32 = arith.constant 0 : i32
    %c0_i32_0 = arith.constant 0 : i32
    %c0_i32_1 = arith.constant 0 : i32
    return %arg0, %c0_i32, %c0_i32_0 : i32, i32, i32
  }
}

</mosaic_0001>

<bundles_post_ra>
// kernel: get_image_forward.1
= control target key start
LH: loop header
LB: loop body
LE: loop exit
PB: predicated region body
PF: predicated region fallthrough
CT: control target
= control target key end

     0   :  { %v2318_v2 = vmov 0.0   ;;  %vm2319_vm0 = vmmov 0   ;;  %s2320_s13 = smov 127   ;;  %v2321_v5 = vmov 0   ;;  %s2322_s14 = smov 126   ;;  %vm38_vm1 = vcmask 1043456   ;;  %s2732_s0 = inlined_call_operand.vmem [shape: bf16[2,8,324], index: 0, kind: input, shape index: {}]   ;;  %s2733_s1 = inlined_call_operand.vmem [shape: bf16[9,3,8], index: 1, kind: input, shape index: {}]   ;;  %s2734_s2 = inlined_call_operand.vmem [shape: f32[2,3,286], index: 2, kind: output, shape index: {}]  }
   0x1   :  { %v2347_v0 = vld [vmem:[%s2732_s0 + $0x8] ss:$0 sps:$4 sm:$0xff]   ;;  %v13_v1 = vld [vmem:[%s2732_s0] sm:$0xff]  ;;  %2053 = vmatprep.subr.bf16.mxu1 %v2318_v2  ;;  %2055 = vmatprep.mubr.msk.bf16.mxu1 %vm2319_vm0, %v2318_v2  ;;  %s2323_s15 = smov 110   ;;  %s2324_s16 = smov 109   ;;  %v1975_v6 = vld [vmem:[%s2732_s0 + $0xc] sm:$0xff] }
   0x2   :  { %v2355_v3 = vcombine.low %v13_v1, %v13_v1  ;;  %29 = vrot.lane.b32.xlu1 %v2347_v0, %s2320_s13  ;;  %v2361_v4 = vcombine.high %v13_v1, %v13_v1  ;;  %80 = vmatprep.mubr.bf16.mxu0 %v2321_v5  ;;  %s2325_s17 = smov 108   ;;  %s2326_s18 = smov 92   ;;  %v2409_v7 = vcombine.high %v1975_v6, %v1975_v6  ;;  %v2422_v9 = vld [vmem:[%s2732_s0 + $0x14] ss:$0 sps:$4 sm:$0xff]   ;;  %v1937_v13 = vld [vmem:[%s2733_s1 + $0x2] sm:$0x3] }
   0x3   :  { %s2327_s19 = smov 91   ;;  %s2328_s20 = smov 90   ;;  %v2413_v8 = vcombine.low %v1975_v6, %v1975_v6  ;;  %vm34_vm2 = vcmask 64512   ;;  %vm31_vm3 = vcmask 1039360   ;;  %v139_v14 = vsel %vm38_vm1, %v2347_v0, 0 }
   0x4   :  { %25 = vrot.lane.b32.xlu0 %v2355_v3, %s2320_s13  ;;  %vm230_vm4 = vcmask 1031168   ;;  %v133_v21 = vsel %vm38_vm1, %v2355_v3, 0  ;;  %v12_v25 = vld [vmem:[%s2733_s1] sm:$0x3]  ;;  %vm337_vm5 = vcmask 900096   ;;  %vm444_vm6 = vcmask 891904  }
   0x5   :  { %v1947_v33 = vld [vmem:[%s2733_s1 + $0x4] sm:$0x3]  ;;  %v1951_v41 = vld [vmem:[%s2733_s1 + $0x6] sm:$0x3]  ;;  %vm551_vm7 = vcmask 883712   ;;  %vm658_vm8 = vcmask 752640  }
   0x6   :  { %224 = vrot.lane.b32.xlu1 %v2355_v3, %s2322_s14  ;;  %v1955_v49 = vld [vmem:[%s2733_s1 + $0x8] sm:$0x3]  ;;  %v1959_v57 = vld [vmem:[%s2733_s1 + $0xa] sm:$0x3]  ;;  %vm765_vm9 = vcmask 744448   ;;  %vm872_vm10 = vcmask 736256  }
   0x7   :  { %v1963_v1 = vld [vmem:[%s2733_s1 + $0xc] sm:$0x3]  ;;  %vm979_vm11 = vcmask 239616  }
   0x8   :  { %27 = vrot.lane.b32.xlu0 %v2361_v4, %s2320_s13 }
   0xa   :  { %228 = vrot.lane.b32.xlu1 %v2347_v0, %s2322_s14 }
   0xc   :  { %226 = vrot.lane.b32.xlu0 %v2361_v4, %s2322_s14 }
   0xe   :  { %333 = vrot.lane.b32.xlu1 %v2361_v4, %s2323_s15 }
  0x10   :  { %331 = vrot.lane.b32.xlu0 %v2355_v3, %s2323_s15 }
  0x12   :  { %438 = vrot.lane.b32.xlu1 %v2355_v3, %s2324_s16 }
  0x14   :  { %335 = vrot.lane.b32.xlu0 %v2347_v0, %s2323_s15 }
  0x16   :  { %442 = vrot.lane.b32.xlu1 %v2347_v0, %s2324_s16 }
  0x18   :  { %440 = vrot.lane.b32.xlu0 %v2361_v4, %s2324_s16 }
  0x1a   :  { %547 = vrot.lane.b32.xlu1 %v2361_v4, %s2325_s17 }
  0x1c   :  { %545 = vrot.lane.b32.xlu0 %v2355_v3, %s2325_s17 }
  0x1e   :  { %652 = vrot.lane.b32.xlu1 %v2355_v3, %s2326_s18 }
  0x20   :  { %549 = vrot.lane.b32.xlu0 %v2347_v0, %s2325_s17 }
  0x22   :  { %656 = vrot.lane.b32.xlu1 %v2347_v0, %s2326_s18 }
  0x24   :  { %654 = vrot.lane.b32.xlu0 %v2361_v4, %s2326_s18 }
  0x26   :  { %761 = vrot.lane.b32.xlu1 %v2361_v4, %s2327_s19 }
  0x28   :  { %759 = vrot.lane.b32.xlu0 %v2355_v3, %s2327_s19 }
  0x2a   :  { %866 = vrot.lane.b32.xlu1 %v2355_v3, %s2328_s20 }
  0x2c   :  { %763 = vrot.lane.b32.xlu0 %v2347_v0, %s2327_s19 }
  0x2e   :  { %870 = vrot.lane.b32.xlu1 %v2347_v0, %s2328_s20 }
  0x30   :  { %868 = vrot.lane.b32.xlu0 %v2361_v4, %s2328_s20 }
  0x32   :  { %996 = vrot.lane.b32.xlu1 %v2409_v7, %s2320_s13 }
  0x34   :  { %994 = vrot.lane.b32.xlu0 %v2413_v8, %s2320_s13 }
  0x36   :  { %1189 = vrot.lane.b32.xlu1 %v2413_v8, %s2322_s14 }
  0x38   :  { %998 = vrot.lane.b32.xlu0 %v2422_v9, %s2320_s13 }
  0x3a   :  { %1193 = vrot.lane.b32.xlu1 %v2422_v9, %s2322_s14 }
  0x3c   :  { %1191 = vrot.lane.b32.xlu0 %v2409_v7, %s2322_s14 }
  0x3e   :  { %1296 = vrot.lane.b32.xlu1 %v2409_v7, %s2323_s15 }
  0x40   :  { %1294 = vrot.lane.b32.xlu0 %v2413_v8, %s2323_s15 }
  0x42   :  { %1399 = vrot.lane.b32.xlu1 %v2413_v8, %s2324_s16 }
  0x44   :  { %1298 = vrot.lane.b32.xlu0 %v2422_v9, %s2323_s15 }
  0x46   :  { %1403 = vrot.lane.b32.xlu1 %v2422_v9, %s2324_s16 }
  0x48   :  { %1401 = vrot.lane.b32.xlu0 %v2409_v7, %s2324_s16 }
  0x4a   :  { %1506 = vrot.lane.b32.xlu1 %v2409_v7, %s2325_s17 }
  0x4c   :  { %1504 = vrot.lane.b32.xlu0 %v2413_v8, %s2325_s17 }
  0x4e   :  { %1609 = vrot.lane.b32.xlu1 %v2413_v8, %s2326_s18 }
  0x50   :  { %1508 = vrot.lane.b32.xlu0 %v2422_v9, %s2325_s17 }
  0x52   :  { %1613 = vrot.lane.b32.xlu1 %v2422_v9, %s2326_s18 }
  0x54   :  { %1611 = vrot.lane.b32.xlu0 %v2409_v7, %s2326_s18 }
  0x56   :  { %1716 = vrot.lane.b32.xlu1 %v2409_v7, %s2327_s19 }
  0x58   :  { %1714 = vrot.lane.b32.xlu0 %v2413_v8, %s2327_s19 }
  0x5a   :  { %1819 = vrot.lane.b32.xlu1 %v2413_v8, %s2328_s20 }
  0x5c   :  { %1718 = vrot.lane.b32.xlu0 %v2422_v9, %s2327_s19 }
  0x5e   :  { %1823 = vrot.lane.b32.xlu1 %v2422_v9, %s2328_s20 }
  0x60   :  { %1821 = vrot.lane.b32.xlu0 %v2409_v7, %s2328_s20 }
  0x74   :  { %v30_v10 = vpop.permute.xlu1 %29 }
  0x75   :  { %v46_v12 = vsel %vm38_vm1, %v30_v10, 0 }
  0x76   :  { %v26_v11 = vpop.permute.xlu0 %25  ;;  %2054 = vmatpush3.bf16.msra.mxu1 %v46_v12 }
  0x77   :  { %2059 = vmatprep.subr.bf16.mxu1 %v2318_v2 }
  0x78   :  { %v225_v15 = vpop.permute.xlu1 %224 }
  0x79   :  { %2056 = vmatmul.mubr.msk.bf16.vlgmr.msra.gmra.mrb[0].mxu1 %vm34_vm2, %v1937_v13 }
  0x7a   :  { %v28_v16 = vpop.permute.xlu0 %27  ;;  %2060 = vmatpush3.bf16.msra.mxu1 %v139_v14  ;;  %2061 = vmatprep.mubr.msk.bf16.mxu1 %vm2319_vm0, %v2318_v2  ;;  %v1967_v14 = vld [vmem:[%s2733_s1 + $0xe] sm:$0x3] }
  0x7b   :  { %v33_v17 = vsel %vm31_vm3, %v28_v16, %v30_v10  ;;  %v32_v18 = vsel %vm31_vm3, %v26_v11, %v28_v16  ;;  %2065 = vmatprep.subr.bf16.mxu1 %v2318_v2 }
  0x7c   :  { %1941 = vmatprep.subr.msk.bf16.mxu0 %vm38_vm1, %v33_v17  ;;  %v40_v19 = vsel %vm38_vm1, %v32_v18, 0  ;;  %v229_v20 = vpop.permute.xlu1 %228 }
  0x7d   :  { %49 = vmatpush1.bf16.msra.mxu0 %v40_v19  ;;  %v243_v26 = vsel %vm38_vm1, %v229_v20, 0 }
  0x7e   :  { %1944 = vmatprep.subr.msk.bf16.mxu0 %vm38_vm1, %v2361_v4  ;;  %v227_v22 = vpop.permute.xlu0 %226 }
  0x7f   :  { %v232_v23 = vsel %vm230_vm4, %v227_v22, %v229_v20  ;;  %v231_v27 = vsel %vm230_vm4, %v225_v15, %v227_v22 }
  0x80   :  { %1942 = vmatmul.mubr.msk.bf16.vlgmr.msra.gmra.mrb[0].mxu0 %vm34_vm2, %v1937_v13  ;;  %v334_v28 = vpop.permute.xlu1 %333  ;;  %v237_v30 = vsel %vm38_vm1, %v231_v27, 0  ;;  %v1105_v27 = vsel %vm38_vm1, %v2422_v9, 0 }
  0x81   :  { %142 = vmatpush1.bf16.msra.mxu0 %v133_v21  ;;  %173 = vmatprep.mubr.bf16.mxu0 %v2321_v5  ;;  %v1971_v21 = vld [vmem:[%s2733_s1 + $0x10] sm:$0x3] }
  0x82   :  { %1948 = vmatprep.subr.msk.bf16.mxu0 %vm38_vm1, %v232_v23  ;;  %v332_v24 = vpop.permute.xlu0 %331 }
  0x83   :  { %v338_v35 = vsel %vm337_vm5, %v332_v24, %v334_v28 }
  0x84   :  { %v439_v32 = vpop.permute.xlu1 %438  ;;  %v344_v38 = vsel %vm38_vm1, %v338_v35, 0 }
  0x85   :  { %2062 = vmatmul.mubr.msk.bf16.vlgmr.msra.gmra.mrb[0].mxu1 %vm34_vm2, %v12_v25 }
  0x86   :  { %2066 = vmatpush3.bf16.msra.mxu1 %v243_v26  ;;  %2067 = vmatprep.mubr.msk.bf16.mxu1 %vm2319_vm0, %v2318_v2  ;;  %v336_v29 = vpop.permute.xlu0 %335  ;;  %v1977_v26 = vld [vmem:[%s2733_s1 + $0x2] sm:$0x3] }
  0x87   :  { %2071 = vmatprep.subr.bf16.mxu1 %v2318_v2  ;;  %v339_v31 = vsel %vm337_vm5, %v334_v28, %v336_v29  ;;  %v350_v34 = vsel %vm38_vm1, %v336_v29, 0 }
  0x88   :  { %v443_v37 = vpop.permute.xlu1 %442 }
  0x89   :  { %v457_v42 = vsel %vm38_vm1, %v443_v37, 0 }
  0x8a   :  { %v441_v36 = vpop.permute.xlu0 %440 }
  0x8b   :  { %v446_v39 = vsel %vm444_vm6, %v441_v36, %v443_v37  ;;  %v445_v43 = vsel %vm444_vm6, %v439_v32, %v441_v36 }
  0x8c   :  { %1945 = vmatmul.mubr.msk.bf16.vlgmr.msra.gmra.mrb[0].mxu0 %vm34_vm2, %v12_v25  ;;  %v548_v44 = vpop.permute.xlu1 %547  ;;  %v451_v46 = vsel %vm38_vm1, %v445_v43, 0 }
  0x8d   :  { %246 = vmatpush1.bf16.msra.mxu0 %v237_v30  ;;  %277 = vmatprep.mubr.bf16.mxu0 %v2321_v5  ;;  %v1099_v30 = vsel %vm38_vm1, %v2413_v8, 0 }
  0x8e   :  { %1952 = vmatprep.subr.msk.bf16.mxu0 %vm38_vm1, %v339_v31  ;;  %v546_v40 = vpop.permute.xlu0 %545  ;;  %v981_v31 = vld [vmem:[%s2733_s1] sm:$0x3] }
  0x8f   :  { %v552_v51 = vsel %vm551_vm7, %v546_v40, %v548_v44 }
  0x90   :  { %v653_v48 = vpop.permute.xlu1 %652  ;;  %v558_v54 = vsel %vm38_vm1, %v552_v51, 0 }
  0x91   :  { %2068 = vmatmul.mubr.msk.bf16.vlgmr.msra.gmra.mrb[0].mxu1 %vm34_vm2, %v1947_v33 }
  0x92   :  { %2072 = vmatpush3.bf16.msra.mxu1 %v350_v34  ;;  %2073 = vmatprep.mubr.msk.bf16.mxu1 %vm2319_vm0, %v2318_v2  ;;  %v550_v45 = vpop.permute.xlu0 %549 }
  0x93   :  { %2077 = vmatprep.subr.bf16.mxu1 %v2318_v2  ;;  %v553_v47 = vsel %vm551_vm7, %v548_v44, %v550_v45  ;;  %v564_v50 = vsel %vm38_vm1, %v550_v45, 0 }
  0x94   :  { %v657_v53 = vpop.permute.xlu1 %656 }
  0x95   :  { %v671_v58 = vsel %vm38_vm1, %v657_v53, 0 }
  0x96   :  { %v655_v52 = vpop.permute.xlu0 %654 }
  0x97   :  { %v660_v55 = vsel %vm658_vm8, %v655_v52, %v657_v53  ;;  %v659_v59 = vsel %vm658_vm8, %v653_v48, %v655_v52 }
  0x98   :  { %1949 = vmatmul.mubr.msk.bf16.vlgmr.msra.gmra.mrb[0].mxu0 %vm34_vm2, %v1947_v33  ;;  %v762_v60 = vpop.permute.xlu1 %761  ;;  %v665_v62 = vsel %vm38_vm1, %v659_v59, 0 }
  0x99   :  { %353 = vmatpush1.bf16.msra.mxu0 %v344_v38  ;;  %384 = vmatprep.mubr.bf16.mxu0 %v2321_v5  ;;  %v1987_v38 = vld [vmem:[%s2733_s1 + $0x4] sm:$0x3] }
  0x9a   :  { %1956 = vmatprep.subr.msk.bf16.mxu0 %vm38_vm1, %v446_v39  ;;  %v760_v56 = vpop.permute.xlu0 %759 }
  0x9b   :  { %v766_v4 = vsel %vm765_vm9, %v760_v56, %v762_v60 }
  0x9c   :  { %v867_v0 = vpop.permute.xlu1 %866  ;;  %v772_v11 = vsel %vm38_vm1, %v766_v4, 0 }
  0x9d   :  { %2074 = vmatmul.mubr.msk.bf16.vlgmr.msra.gmra.mrb[0].mxu1 %vm34_vm2, %v1951_v41 }
  0x9e   :  { %2078 = vmatpush3.bf16.msra.mxu1 %v457_v42  ;;  %2079 = vmatprep.mubr.msk.bf16.mxu1 %vm2319_vm0, %v2318_v2  ;;  %v764_v61 = vpop.permute.xlu0 %763 }
  0x9f   :  { %2083 = vmatprep.subr.bf16.mxu1 %v2318_v2  ;;  %v767_v63 = vsel %vm765_vm9, %v762_v60, %v764_v61  ;;  %v778_v3 = vsel %vm38_vm1, %v764_v61, 0 }
  0xa0   :  { %v871_v10 = vpop.permute.xlu1 %870 }
  0xa1   :  { %v885_v15 = vsel %vm38_vm1, %v871_v10, 0 }
  0xa2   :  { %v869_v6 = vpop.permute.xlu0 %868 }
  0xa3   :  { %v874_v12 = vsel %vm872_vm10, %v869_v6, %v871_v10  ;;  %v873_v16 = vsel %vm872_vm10, %v867_v0, %v869_v6 }
  0xa4   :  { %1953 = vmatmul.mubr.msk.bf16.vlgmr.msra.gmra.mrb[0].mxu0 %vm34_vm2, %v1951_v41  ;;  %v997_v17 = vpop.permute.xlu1 %996  ;;  %v879_v19 = vsel %vm38_vm1, %v873_v16, 0 }
  0xa5   :  { %460 = vmatpush1.bf16.msra.mxu0 %v451_v46  ;;  %491 = vmatprep.mubr.bf16.mxu0 %v2321_v5  ;;  %v1991_v46 = vld [vmem:[%s2733_s1 + $0x6] sm:$0x3] }
  0xa6   :  { %1960 = vmatprep.subr.msk.bf16.mxu0 %vm38_vm1, %v553_v47  ;;  %v995_v13 = vpop.permute.xlu0 %994 }
  0xa7   :  { %v1000_v23 = vsel %vm31_vm3, %v995_v13, %v997_v17 }
  0xa8   :  { %v1006_v24 = vsel %vm38_vm1, %v1000_v23, 0  ;;  %v1190_v25 = vpop.permute.xlu1 %1189 }
  0xa9   :  { %2080 = vmatmul.mubr.msk.bf16.vlgmr.msra.gmra.mrb[0].mxu1 %vm34_vm2, %v1955_v49 }
  0xaa   :  { %2084 = vmatpush3.bf16.msra.mxu1 %v564_v50  ;;  %2085 = vmatprep.mubr.msk.bf16.mxu1 %vm2319_vm0, %v2318_v2  ;;  %v999_v18 = vpop.permute.xlu0 %998 }
  0xab   :  { %2089 = vmatprep.subr.bf16.mxu1 %v2318_v2  ;;  %v1001_v20 = vsel %vm31_vm3, %v997_v17, %v999_v18  ;;  %v1012_v22 = vsel %vm38_vm1, %v999_v18, 0  ;;  %v2007_v18 = vld [vmem:[%s2733_s1 + $0xe] sm:$0x3] }
  0xac   :  { %v1194_v29 = vpop.permute.xlu1 %1193 }
  0xad   :  { %v1207_v32 = vsel %vm38_vm1, %v1194_v29, 0 }
  0xae   :  { %v1192_v28 = vpop.permute.xlu0 %1191 }
  0xaf   :  { %v1196_v9 = vsel %vm230_vm4, %v1192_v28, %v1194_v29  ;;  %v1195_v8 = vsel %vm230_vm4, %v1190_v25, %v1192_v28 }
  0xb0   :  { %1957 = vmatmul.mubr.msk.bf16.vlgmr.msra.gmra.mrb[0].mxu0 %vm34_vm2, %v1955_v49  ;;  %v1297_v33 = vpop.permute.xlu1 %1296  ;;  %v1201_v35 = vsel %vm38_vm1, %v1195_v8, 0 }
  0xb1   :  { %567 = vmatpush1.bf16.msra.mxu0 %v558_v54  ;;  %598 = vmatprep.mubr.bf16.mxu0 %v2321_v5  ;;  %v1995_v54 = vld [vmem:[%s2733_s1 + $0x8] sm:$0x3] }
  0xb2   :  { %1964 = vmatprep.subr.msk.bf16.mxu0 %vm38_vm1, %v660_v55 }
  0xb4   :  { %v1400_v37 = vpop.permute.xlu1 %1399 }
  0xb5   :  { %2086 = vmatmul.mubr.msk.bf16.vlgmr.msra.gmra.mrb[0].mxu1 %vm34_vm2, %v1959_v57 }
  0xb6   :  { %2090 = vmatpush3.bf16.msra.mxu1 %v671_v58  ;;  %2091 = vmatprep.mubr.msk.bf16.mxu1 %vm2319_vm0, %v2318_v2 }
  0xb7   :  { %2095 = vmatprep.subr.bf16.mxu1 %v2318_v2 }
  0xb8   :  { %v1404_v42 = vpop.permute.xlu1 %1403 }
  0xb9   :  { %v1417_v47 = vsel %vm38_vm1, %v1404_v42, 0 }
  0xbc   :  { %1961 = vmatmul.mubr.msk.bf16.vlgmr.msra.gmra.mrb[0].mxu0 %vm34_vm2, %v1959_v57  ;;  %v1507_v49 = vpop.permute.xlu1 %1506 }
  0xbd   :  { %674 = vmatpush1.bf16.msra.mxu0 %v665_v62  ;;  %705 = vmatprep.mubr.bf16.mxu0 %v2321_v5  ;;  %v1999_v62 = vld [vmem:[%s2733_s1 + $0xa] sm:$0x3] }
  0xbe   :  { %1968 = vmatprep.subr.msk.bf16.mxu0 %vm38_vm1, %v767_v63 }
  0xc0   :  { %v1610_v53 = vpop.permute.xlu1 %1609 }
  0xc1   :  { %2092 = vmatmul.mubr.msk.bf16.vlgmr.msra.gmra.mrb[0].mxu1 %vm34_vm2, %v1963_v1 }
  0xc2   :  { %2096 = vmatpush3.bf16.msra.mxu1 %v778_v3  ;;  %2097 = vmatprep.mubr.msk.bf16.mxu1 %vm2319_vm0, %v2318_v2 }
  0xc3   :  { %2101 = vmatprep.subr.bf16.mxu1 %v2318_v2 }
  0xc4   :  { %v1614_v58 = vpop.permute.xlu1 %1613 }
  0xc5   :  { %v1627_v63 = vsel %vm38_vm1, %v1614_v58, 0 }
  0xc8   :  { %1965 = vmatmul.mubr.msk.bf16.vlgmr.msra.gmra.mrb[0].mxu0 %vm34_vm2, %v1963_v1  ;;  %v1717_v1 = vpop.permute.xlu1 %1716 }
  0xc9   :  { %781 = vmatpush1.bf16.msra.mxu0 %v772_v11  ;;  %812 = vmatprep.mubr.bf16.mxu0 %v2321_v5  ;;  %v2003_v11 = vld [vmem:[%s2733_s1 + $0xc] sm:$0x3] }
  0xca   :  { %1972 = vmatprep.subr.msk.bf16.mxu0 %vm38_vm1, %v874_v12 }
  0xcc   :  { %v1820_v10 = vpop.permute.xlu1 %1819 }
  0xcd   :  { %2098 = vmatmul.mubr.msk.bf16.vlgmr.msra.gmra.mrb[0].mxu1 %vm34_vm2, %v1967_v14 }
  0xce   :  { %2102 = vmatpush3.bf16.msra.mxu1 %v885_v15  ;;  %2103 = vmatprep.mubr.msk.bf16.mxu1 %vm2319_vm0, %v2318_v2 }
  0xcf   :  { %2107 = vmatprep.subr.bf16.mxu1 %v2318_v2 }
  0xd0   :  { %v1824_v15 = vpop.permute.xlu1 %1823 }
  0xd4   :  { %1969 = vmatmul.mubr.msk.bf16.vlgmr.msra.gmra.mrb[0].mxu0 %vm34_vm2, %v1967_v14 }
  0xd5   :  { %888 = vmatpush1.bf16.msra.mxu0 %v879_v19  ;;  %919 = vmatprep.mubr.bf16.mxu0 %v2321_v5  ;;  %v1837_v19 = vsel %vm38_vm1, %v1824_v15, 0 }
  0xd6   :  { %1981 = vmatprep.subr.msk.bf16.mxu0 %vm38_vm1, %v1001_v20 }
  0xd9   :  { %2104 = vmatmul.mubr.msk.bf16.vlgmr.msra.gmra.mrb[0].mxu1 %vm34_vm2, %v1971_v21 }
  0xda   :  { %2108 = vmatpush3.bf16.msra.mxu1 %v1012_v22  ;;  %2109 = vmatprep.mubr.msk.bf16.mxu1 %vm2319_vm0, %v2318_v2  ;;  %v2011_v22 = vld [vmem:[%s2733_s1 + $0x10] sm:$0x3] }
  0xdb   :  { %2113 = vmatprep.subr.bf16.mxu1 %v2318_v2 }
  0xe0   :  { %1973 = vmatmul.mubr.msk.bf16.vlgmr.msra.gmra.mrb[0].mxu0 %vm34_vm2, %v1971_v21 }
  0xe1   :  { %1015 = vmatpush1.bf16.msra.mxu0 %v1006_v24  ;;  %1046 = vmatprep.mubr.bf16.mxu0 %v2321_v5 }
  0xe2   :  { %2110 = vmatmul.mubr.msk.bf16.vlgmr.msra.gmra.mrb[4].mxu1 %vm34_vm2, %v1977_v26  ;;  %1984 = vmatprep.subr.msk.bf16.mxu0 %vm38_vm1, %v2409_v7  ;;  %v1295_v7 = vpop.permute.xlu0 %1294 }
  0xe3   :  { %2114 = vmatpush3.bf16.msra.mxu1 %v1105_v27  ;;  %2115 = vmatprep.mubr.msk.bf16.mxu1 %vm2319_vm0, %v2318_v2  ;;  %v1300_v40 = vsel %vm337_vm5, %v1295_v7, %v1297_v33 }
  0xe4   :  { %2119 = vmatprep.subr.bf16.mxu1 %v2318_v2  ;;  %v1306_v43 = vsel %vm38_vm1, %v1300_v40, 0 }
  0xe6   :  { %v1299_v34 = vpop.permute.xlu0 %1298 }
  0xe7   :  { %v1301_v36 = vsel %vm337_vm5, %v1297_v33, %v1299_v34  ;;  %v1312_v39 = vsel %vm38_vm1, %v1299_v34, 0 }
  0xe8   :  { %1982 = vmatmul.mubr.msk.bf16.vlgmr.msra.gmra.mrb[4].mxu0 %vm34_vm2, %v1977_v26 }
  0xe9   :  { %1108 = vmatpush1.bf16.msra.mxu0 %v1099_v30  ;;  %1139 = vmatprep.mubr.bf16.mxu0 %v2321_v5 }
  0xea   :  { %1988 = vmatprep.subr.msk.bf16.mxu0 %vm38_vm1, %v1196_v9  ;;  %v1402_v41 = vpop.permute.xlu0 %1401 }
  0xeb   :  { %v1406_v44 = vsel %vm444_vm6, %v1402_v41, %v1404_v42  ;;  %v1405_v48 = vsel %vm444_vm6, %v1400_v37, %v1402_v41 }
  0xec   :  { %v1411_v51 = vsel %vm38_vm1, %v1405_v48, 0 }
  0xee   :  { %2116 = vmatmul.mubr.msk.bf16.vlgmr.msra.gmra.mrb[4].mxu1 %vm34_vm2, %v981_v31  ;;  %v1505_v45 = vpop.permute.xlu0 %1504 }
  0xef   :  { %2120 = vmatpush3.bf16.msra.mxu1 %v1207_v32  ;;  %2121 = vmatprep.mubr.msk.bf16.mxu1 %vm2319_vm0, %v2318_v2  ;;  %v1510_v56 = vsel %vm551_vm7, %v1505_v45, %v1507_v49 }
  0xf0   :  { %2125 = vmatprep.subr.bf16.mxu1 %v2318_v2  ;;  %v1516_v59 = vsel %vm38_vm1, %v1510_v56, 0 }
  0xf2   :  { %v1509_v50 = vpop.permute.xlu0 %1508 }
  0xf3   :  { %v1511_v52 = vsel %vm551_vm7, %v1507_v49, %v1509_v50  ;;  %v1522_v55 = vsel %vm38_vm1, %v1509_v50, 0 }
  0xf4   :  { %1985 = vmatmul.mubr.msk.bf16.vlgmr.msra.gmra.mrb[4].mxu0 %vm34_vm2, %v981_v31 }
  0xf5   :  { %1210 = vmatpush1.bf16.msra.mxu0 %v1201_v35  ;;  %1241 = vmatprep.mubr.bf16.mxu0 %v2321_v5 }
  0xf6   :  { %1992 = vmatprep.subr.msk.bf16.mxu0 %vm38_vm1, %v1301_v36  ;;  %v1612_v57 = vpop.permute.xlu0 %1611 }
  0xf7   :  { %v1616_v60 = vsel %vm658_vm8, %v1612_v57, %v1614_v58  ;;  %v1615_v0 = vsel %vm658_vm8, %v1610_v53, %v1612_v57 }
  0xf8   :  { %v1621_v4 = vsel %vm38_vm1, %v1615_v0, 0 }
  0xfa   :  { %2122 = vmatmul.mubr.msk.bf16.vlgmr.msra.gmra.mrb[4].mxu1 %vm34_vm2, %v1987_v38  ;;  %v1715_v61 = vpop.permute.xlu0 %1714 }
  0xfb   :  { %2126 = vmatpush3.bf16.msra.mxu1 %v1312_v39  ;;  %2127 = vmatprep.mubr.msk.bf16.mxu1 %vm2319_vm0, %v2318_v2  ;;  %v1720_v13 = vsel %vm765_vm9, %v1715_v61, %v1717_v1 }
  0xfc   :  { %2131 = vmatprep.subr.bf16.mxu1 %v2318_v2  ;;  %v1726_v16 = vsel %vm38_vm1, %v1720_v13, 0 }
  0xfe   :  { %v1719_v3 = vpop.permute.xlu0 %1718 }
  0xff   :  { %v1721_v6 = vsel %vm765_vm9, %v1717_v1, %v1719_v3  ;;  %v1732_v12 = vsel %vm38_vm1, %v1719_v3, 0 }
 0x100   :  { %1989 = vmatmul.mubr.msk.bf16.vlgmr.msra.gmra.mrb[4].mxu0 %vm34_vm2, %v1987_v38 }
 0x101   :  { %1315 = vmatpush1.bf16.msra.mxu0 %v1306_v43  ;;  %1346 = vmatprep.mubr.bf16.mxu0 %v2321_v5 }
 0x102   :  { %1996 = vmatprep.subr.msk.bf16.mxu0 %vm38_vm1, %v1406_v44  ;;  %v1822_v14 = vpop.permute.xlu0 %1821 }
 0x103   :  { %v1826_v17 = vsel %vm872_vm10, %v1822_v14, %v1824_v15  ;;  %v1825_v20 = vsel %vm872_vm10, %v1820_v10, %v1822_v14 }
 0x104   :  { %v1831_v21 = vsel %vm38_vm1, %v1825_v20, 0 }
 0x106   :  { %2128 = vmatmul.mubr.msk.bf16.vlgmr.msra.gmra.mrb[4].mxu1 %vm34_vm2, %v1991_v46 }
 0x107   :  { %2132 = vmatpush3.bf16.msra.mxu1 %v1417_v47  ;;  %2133 = vmatprep.mubr.msk.bf16.mxu1 %vm2319_vm0, %v2318_v2 }
 0x108   :  { %2137 = vmatprep.subr.bf16.mxu1 %v2318_v2 }
 0x10c   :  { %1993 = vmatmul.mubr.msk.bf16.vlgmr.msra.gmra.mrb[4].mxu0 %vm34_vm2, %v1991_v46 }
 0x10d   :  { %1420 = vmatpush1.bf16.msra.mxu0 %v1411_v51  ;;  %1451 = vmatprep.mubr.bf16.mxu0 %v2321_v5 }
 0x10e   :  { %2000 = vmatprep.subr.msk.bf16.mxu0 %vm38_vm1, %v1511_v52 }
 0x112   :  { %2134 = vmatmul.mubr.msk.bf16.vlgmr.msra.gmra.mrb[4].mxu1 %vm34_vm2, %v1995_v54 }
 0x113   :  { %2138 = vmatpush3.bf16.msra.mxu1 %v1522_v55  ;;  %2139 = vmatprep.mubr.msk.bf16.mxu1 %vm2319_vm0, %v2318_v2 }
 0x114   :  { %2143 = vmatprep.subr.bf16.mxu1 %v2318_v2 }
 0x118   :  { %1997 = vmatmul.mubr.msk.bf16.vlgmr.msra.gmra.mrb[4].mxu0 %vm34_vm2, %v1995_v54 }
 0x119   :  { %1525 = vmatpush1.bf16.msra.mxu0 %v1516_v59  ;;  %1556 = vmatprep.mubr.bf16.mxu0 %v2321_v5 }
 0x11a   :  { %2004 = vmatprep.subr.msk.bf16.mxu0 %vm38_vm1, %v1616_v60 }
 0x11e   :  { %2140 = vmatmul.mubr.msk.bf16.vlgmr.msra.gmra.mrb[4].mxu1 %vm34_vm2, %v1999_v62 }
 0x11f   :  { %2144 = vmatpush3.bf16.msra.mxu1 %v1627_v63  ;;  %2145 = vmatprep.mubr.msk.bf16.mxu1 %vm2319_vm0, %v2318_v2 }
 0x120   :  { %2149 = vmatprep.subr.bf16.mxu1 %v2318_v2 }
 0x124   :  { %2001 = vmatmul.mubr.msk.bf16.vlgmr.msra.gmra.mrb[4].mxu0 %vm34_vm2, %v1999_v62 }
 0x125   :  { %1630 = vmatpush1.bf16.msra.mxu0 %v1621_v4  ;;  %1661 = vmatprep.mubr.bf16.mxu0 %v2321_v5 }
 0x126   :  { %2008 = vmatprep.subr.msk.bf16.mxu0 %vm38_vm1, %v1721_v6 }
 0x12a   :  { %2146 = vmatmul.mubr.msk.bf16.vlgmr.msra.gmra.mrb[4].mxu1 %vm34_vm2, %v2003_v11 }
 0x12b   :  { %2150 = vmatpush3.bf16.msra.mxu1 %v1732_v12  ;;  %2151 = vmatprep.mubr.msk.bf16.mxu1 %vm2319_vm0, %v2318_v2 }
 0x12c   :  { %2155 = vmatprep.subr.bf16.mxu1 %v2318_v2 }
 0x130   :  { %2005 = vmatmul.mubr.msk.bf16.vlgmr.msra.gmra.mrb[4].mxu0 %vm34_vm2, %v2003_v11 }
 0x131   :  { %1735 = vmatpush1.bf16.msra.mxu0 %v1726_v16  ;;  %1766 = vmatprep.mubr.bf16.mxu0 %v2321_v5 }
 0x132   :  { %2012 = vmatprep.subr.msk.bf16.mxu0 %vm38_vm1, %v1826_v17 }
 0x136   :  { %2152 = vmatmul.mubr.msk.bf16.vlgmr.msra.gmra.mrb[4].mxu1 %vm34_vm2, %v2007_v18 }
 0x137   :  { %2156 = vmatpush3.bf16.msra.mxu1 %v1837_v19  ;;  %2157 = vmatprep.mubr.msk.bf16.mxu1 %vm2319_vm0, %v2318_v2 }
 0x13c   :  { %2009 = vmatmul.mubr.msk.bf16.vlgmr.msra.gmra.mrb[4].mxu0 %vm34_vm2, %v2007_v18 }
 0x13d   :  { %1840 = vmatpush1.bf16.msra.mxu0 %v1831_v21  ;;  %1871 = vmatprep.mubr.bf16.mxu0 %v2321_v5 }
 0x142   :  { %2158 = vmatmul.mubr.msk.bf16.vlgmr.msra.gmra.mrb[4].mxu1 %vm34_vm2, %v2011_v22 }
 0x148   :  { %2013 = vmatmul.mubr.msk.bf16.vlgmr.msra.gmra.mrb[4].mxu0 %vm34_vm2, %v2011_v22 }
 0x1ac   :  { %v962_v23 = vpop.f32.mrb[0].mxu1 }
 0x1ad   :  { %2306 = vtanh.f32 %v962_v23  ;;  %v2105_v24 = vpop.f32.mrb[1].mxu1 }
 0x1ae   :  { %v965_v25 = vpop.f32.mrb[2].mxu1 }
 0x1af   :  { %v2106_v2 = vpop.f32.mrb[3].mxu1 }
 0x1b3   :  { %v921_v26 = vpop.f32.mrb[0].mxu0 }
 0x1b4   :  { %2308 = vtanh.f32 %v921_v26  ;;  %v923_v27 = vpop.f32.mrb[1].mxu0 }
 0x1b5   :  { %2310 = vtanh.f32 %v923_v27  ;;  %v925_v28 = vpop.f32.mrb[2].mxu0 }
 0x1b6   :  { %v926_v5 = vpop.f32.mrb[3].mxu0 }
 0x1b7   :  { %v2307_v29 = vpop.eup %2306 }
 0x1b8   :  { %980 = vst.msk [vmem:[%s2734_s2 + $0x8] sm:$0x7] %vm979_vm11, %v2307_v29 }
 0x1be   :  { %v2309_v30 = vpop.eup %2308 }
 0x1bf   :  { %v2311_v9 = vpop.eup %2310 }
 0x1c0   :  { %v976_v7 = vcombine.low %v2309_v30, %v2311_v9 }
 0x1c2   :  { %978 = vst [vmem:[%s2734_s2] sm:$0x77] %v976_v7 }
 0x215   :  { %v1914_v31 = vpop.f32.mrb[4].mxu1 }
 0x216   :  { %2312 = vtanh.f32 %v1914_v31  ;;  %v2159_v32 = vpop.f32.mrb[5].mxu1 }
 0x217   :  { %v1917_v8 = vpop.f32.mrb[6].mxu1 }
 0x218   :  { %v2160_v33 = vpop.f32.mrb[7].mxu1 }
 0x21b   :  { %v1873_v34 = vpop.f32.mrb[4].mxu0 }
 0x21c   :  { %2314 = vtanh.f32 %v1873_v34  ;;  %v1875_v35 = vpop.f32.mrb[5].mxu0 }
 0x21d   :  { %2316 = vtanh.f32 %v1875_v35  ;;  %v1877_v36 = vpop.f32.mrb[6].mxu0 }
 0x21e   :  { %v1878_v37 = vpop.f32.mrb[7].mxu0 }
 0x220   :  { %v2313_v38 = vpop.eup %2312 }
 0x221   :  { %2016 = vst.msk [vmem:[%s2734_s2 + $0x14] sm:$0x7] %vm979_vm11, %v2313_v38 }
 0x226   :  { %v2315_v39 = vpop.eup %2314 }
 0x227   :  { %v2317_v40 = vpop.eup %2316 }
 0x228   :  { %v1928_v41 = vcombine.low %v2315_v39, %v2317_v40 }
 0x22a   :  { %2015 = vst [vmem:[%s2734_s2 + $0xc] sm:$0x77] %v1928_v41 }

</bundles_post_ra>
